<compile_context>
chip_gen: v6e
topology: v6e:2x2x1
jax: 0.10.0
libtpu: 0.0.40
codegen_flags: <defaults>
</compile_context>

<pallas_src>
import functools

import numpy as np

import jax
import jax.numpy as jnp
from jax import lax
from jax.experimental import pallas as pl
from jax.experimental.pallas import tpu as pltpu


_VMEM_LIMIT_BYTES = 32 * 1024 * 1024   # explicit scoped-VMEM headroom (v5e default is 16 MiB)


# -----------------------------------------------------------------------------
# pltpu.roll sign-convention probe (one tiny kernel, cached).
# -----------------------------------------------------------------------------
_ROLL_SIGN = None


def _probe_roll_sign():
    """Determine whether pltpu.roll matches jnp.roll (out[i] = x[i - shift])."""
    global _ROLL_SIGN
    if _ROLL_SIGN is not None:
        return _ROLL_SIGN

    def kern(x_ref, o_ref):
        o_ref[...] = pltpu.roll(x_ref[...], shift=1, axis=1)

    with jax.ensure_compile_time_eval():
        x = jnp.arange(8 * 128, dtype=jnp.float32).reshape(8, 128)
        y = pl.pallas_call(
            kern, out_shape=jax.ShapeDtypeStruct((8, 128), jnp.float32))(x)
        matches_jnp = bool(jnp.array_equal(y, jnp.roll(x, 1, axis=1)))
    _ROLL_SIGN = -1 if matches_jnp else 1
    return _ROLL_SIGN


def _roll_gather(x, off, P):
    """Return y with y[:, i] = x[:, (i + off) % P]  (off is a static int)."""
    off %= P
    if off == 0:
        return x
    shift = (_ROLL_SIGN * off) % P
    return pltpu.roll(x, shift=shift, axis=1)


# -----------------------------------------------------------------------------
# im2col slab layout helpers.
# -----------------------------------------------------------------------------
def _slab_config(cin):
    """(slab dtype, per-tap row group, padded contraction depth K)."""
    if cin % 2:                                   # odd cin (the network stem, cin=1)
        dtype, group, tile = jnp.float32, cin, 8  # f32: any row offset stores cleanly
    else:
        dtype, tile = jnp.bfloat16, 16
        group = cin if cin % 16 == 0 else ((cin + 15) // 16) * 16
    k = 27 * group
    k_pad = ((k + tile - 1) // tile) * tile
    return dtype, group, k_pad


def _pack_weight(w, group, k_pad, dtype):
    """(cout, 27, cin) f32 -> (cout, k_pad) slab-dtype, tap-major / cin-minor."""
    cout, _, cin = w.shape
    if group != cin:
        w = jnp.pad(w, ((0, 0), (0, 0), (0, group - cin)))
    wk = w.reshape(cout, 27 * group)
    if k_pad != 27 * group:
        wk = jnp.pad(wk, ((0, 0), (0, k_pad - 27 * group)))
    return wk.astype(dtype)


# -----------------------------------------------------------------------------
# In-kernel boundary masks, generated from a lane iota (no HBM mask buffer).
# Requires power-of-two H and W (guaranteed by the dispatch below).
# -----------------------------------------------------------------------------
def _build_masks(D, H, W):
    P = D * H * W
    log_w = W.bit_length() - 1
    log_h = H.bit_length() - 1
    p = lax.broadcasted_iota(jnp.int32, (1, P), 1)
    wi = jnp.bitwise_and(p, W - 1)
    hi = jnp.bitwise_and(jnp.right_shift(p, log_w), H - 1)
    di = jnp.right_shift(p, log_w + log_h)
    hw_masks = {}
    for kh in (-1, 0, 1):
        for kw in (-1, 0, 1):
            conds = []
            if kh == -1:
                conds.append(hi >= 1)
            elif kh == 1:
                conds.append(hi <= H - 2)
            if kw == -1:
                conds.append(wi >= 1)
            elif kw == 1:
                conds.append(wi <= W - 2)
            m = None
            for c in conds:
                m = c if m is None else jnp.logical_and(m, c)
            hw_masks[(kh, kw)] = m
    d_masks = {-1: di >= 1, 0: None, 1: di <= D - 2}
    return hw_masks, d_masks


# -----------------------------------------------------------------------------
# One conv+BN(+ReLU) stage: hierarchical-roll im2col into a VMEM slab, then one
# large-K MXU matmul with f32 accumulation and the folded-BN epilogue.
# -----------------------------------------------------------------------------
def _conv_stage(load_x, w_ref, scale_ref, shift_ref, slab_ref, hw_masks, d_masks,
                *, cin, group, P, H, W, relu):
    HW = H * W
    sdt = slab_ref.dtype
    k_real = 27 * group
    k_pad = slab_ref.shape[0]
    if k_pad > k_real:
        # Tail pad rows: scratch VMEM is not zero-initialised, zero them once.
        slab_ref[k_real:k_pad, :] = jnp.zeros((k_pad - k_real, P), sdt)
    n_zero = group - cin

    for kh in (-1, 0, 1):
        for kw in (-1, 0, 1):
            # Reload the source per (kh,kw) group -> no (cin, P) value is held
            # live across all 27 taps (vld has slack; vregs do not).
            x = load_x()                                       # (cin, P) slab dtype
            y = _roll_gather(x, kh * W + kw, P)                # intra-lane roll
            m = hw_masks[(kh, kw)]
            if m is not None:
                y = jnp.where(m, y, jnp.zeros_like(y))
            for kd in (-1, 0, 1):
                t = (kd + 1) * 9 + (kh + 1) * 3 + (kw + 1)
                z = y if kd == 0 else _roll_gather(y, kd * HW, P)  # cheap +-HW roll
                dm = d_masks[kd]
                if dm is not None:
                    z = jnp.where(dm, z, jnp.zeros_like(z))
                if n_zero:
                    # cin=8: pad the tap group to a full 16-row bf16 tile so the
                    # slab store stays tile-aligned (no packed sub-tile stores).
                    z = jnp.concatenate(
                        [z, jnp.zeros((n_zero, P), sdt)], axis=0)
                slab_ref[t * group:(t + 1) * group, :] = z

    acc = jnp.dot(w_ref[...], slab_ref[...],
                  preferred_element_type=jnp.float32)          # (cout, P) f32
    acc = acc * scale_ref[...] + shift_ref[...]                # folded BatchNorm
    if relu:
        acc = jnp.maximum(acc, 0.0)
    return acc


def _double_conv_kernel(x_ref, w1_ref, s1_ref, b1_ref, w2_ref, s2_ref, b2_ref,
                        o_ref, slab1, slab2, y1_ref, *,
                        cin, g1, cmid, g2, D, H, W):
    P = D * H * W
    hw_masks, d_masks = _build_masks(D, H, W)

    load_x = lambda: x_ref[0].astype(slab1.dtype)
    y1 = _conv_stage(load_x, w1_ref, s1_ref, b1_ref, slab1, hw_masks, d_masks,
                     cin=cin, group=g1, P=P, H=H, W=W, relu=True)
    y1_ref[...] = y1.astype(y1_ref.dtype)          # stash the intermediate in bf16

    load_y1 = lambda: y1_ref[...]
    y2 = _conv_stage(load_y1, w2_ref, s2_ref, b2_ref, slab2, hw_masks, d_masks,
                     cin=cmid, group=g2, P=P, H=H, W=W, relu=True)
    o_ref[0] = y2.astype(o_ref.dtype)


def _final_kernel(x_ref, w1_ref, s1_ref, b1_ref, w3_ref, b3_ref,
                  o_ref, slab1, *, cin, g1, D, H, W):
    P = D * H * W
    hw_masks, d_masks = _build_masks(D, H, W)

    load_x = lambda: x_ref[0].astype(slab1.dtype)
    y1 = _conv_stage(load_x, w1_ref, s1_ref, b1_ref, slab1, hw_masks, d_masks,
                     cin=cin, group=g1, P=P, H=H, W=W, relu=True)
    # Final 1x1x1 conv (Cout=1) + bias folded into the epilogue.
    y = jnp.sum(y1 * w3_ref[...], axis=0, keepdims=True) + b3_ref[...]
    o_ref[0] = y.astype(o_ref.dtype)


# -----------------------------------------------------------------------------
# pallas_call wrappers.
# -----------------------------------------------------------------------------
def _double_conv_block(x, p1, p2):
    """x: (N, Cin, D, H, W) bf16 -> (N, Cout, D, H, W) bf16 (two fused convs)."""
    _probe_roll_sign()
    N, Cin, D, H, W = x.shape
    P = D * H * W
    Cmid = p1["w"].shape[0]
    Cout = p2["w"].shape[0]
    dt1, g1, K1 = _slab_config(Cin)
    dt2, g2, K2 = _slab_config(Cmid)
    w1 = _pack_weight(p1["w"], g1, K1, dt1)
    w2 = _pack_weight(p2["w"], g2, K2, dt2)

    kernel = functools.partial(_double_conv_kernel, cin=Cin, g1=g1,
                               cmid=Cmid, g2=g2, D=D, H=H, W=W)
    out = pl.pallas_call(
        kernel,
        out_shape=jax.ShapeDtypeStruct((N, Cout, P), jnp.bfloat16),
        grid=(N,),
        in_specs=[
            pl.BlockSpec((1, Cin, P), lambda n: (n, 0, 0)),
            pl.BlockSpec((Cmid, K1), lambda n: (0, 0)),
            pl.BlockSpec((Cmid, 1), lambda n: (0, 0)),
            pl.BlockSpec((Cmid, 1), lambda n: (0, 0)),
            pl.BlockSpec((Cout, K2), lambda n: (0, 0)),
            pl.BlockSpec((Cout, 1), lambda n: (0, 0)),
            pl.BlockSpec((Cout, 1), lambda n: (0, 0)),
        ],
        out_specs=pl.BlockSpec((1, Cout, P), lambda n: (n, 0, 0)),
        scratch_shapes=[
            pltpu.VMEM((K1, P), dt1),
            pltpu.VMEM((K2, P), dt2),
            pltpu.VMEM((Cmid, P), jnp.bfloat16),
        ],
        compiler_params=pltpu.CompilerParams(
            dimension_semantics=("parallel",),
            vmem_limit_bytes=_VMEM_LIMIT_BYTES),
    )(x.reshape(N, Cin, P), w1, p1["scale"], p1["shift"],
      w2, p2["scale"], p2["shift"])
    return out.reshape(N, Cout, D, H, W)


def _final_block(x, cb, w3, b3):
    """conv_block(2s, s) fused with the 1x1x1 conv (s -> 1, with bias)."""
    _probe_roll_sign()
    N, Cin, D, H, W = x.shape
    P = D * H * W
    Cmid = cb["w"].shape[0]
    dt1, g1, K1 = _slab_config(Cin)
    w1 = _pack_weight(cb["w"], g1, K1, dt1)

    kernel = functools.partial(_final_kernel, cin=Cin, g1=g1, D=D, H=H, W=W)
    out = pl.pallas_call(
        kernel,
        out_shape=jax.ShapeDtypeStruct((N, 1, P), jnp.float32),
        grid=(N,),
        in_specs=[
            pl.BlockSpec((1, Cin, P), lambda n: (n, 0, 0)),
            pl.BlockSpec((Cmid, K1), lambda n: (0, 0)),
            pl.BlockSpec((Cmid, 1), lambda n: (0, 0)),
            pl.BlockSpec((Cmid, 1), lambda n: (0, 0)),
            pl.BlockSpec((Cmid, 1), lambda n: (0, 0)),
            pl.BlockSpec((1, 1), lambda n: (0, 0)),
        ],
        out_specs=pl.BlockSpec((1, 1, P), lambda n: (n, 0, 0)),
        scratch_shapes=[pltpu.VMEM((K1, P), dt1)],
        compiler_params=pltpu.CompilerParams(
            dimension_semantics=("parallel",),
            vmem_limit_bytes=_VMEM_LIMIT_BYTES),
    )(x.reshape(N, Cin, P), w1, cb["scale"], cb["shift"], w3, b3)
    return out.reshape(N, 1, D, H, W)


# -----------------------------------------------------------------------------
# XLA fallback for the deep levels (< 128 voxels: 4^3 and 2^3) where a Pallas
# call is pure lane-padding / fixed overhead (per the performance review).
# -----------------------------------------------------------------------------
def _conv_bn_relu_xla(x, p):
    cout, _, cin = p["w"].shape
    w5 = jnp.transpose(p["w"].reshape(cout, 3, 3, 3, cin), (0, 4, 1, 2, 3))
    y = lax.conv_general_dilated(
        x.astype(jnp.bfloat16), w5.astype(jnp.bfloat16),
        window_strides=(1, 1, 1), padding=[(1, 1)] * 3,
        dimension_numbers=("NCDHW", "OIDHW", "NCDHW"),
        preferred_element_type=jnp.float32)
    cshape = (1, cout, 1, 1, 1)
    y = y * p["scale"].reshape(cshape) + p["shift"].reshape(cshape)
    return jnp.maximum(y, 0.0).astype(jnp.bfloat16)


def _pallas_ok(D, H, W):
    pow2 = lambda v: v >= 1 and (v & (v - 1)) == 0
    return (D * H * W) % 128 == 0 and pow2(H) and pow2(W)


def _unet_block(x, p1, p2):
    D, H, W = x.shape[2:]
    if _pallas_ok(D, H, W):
        return _double_conv_block(x, p1, p2)
    # TODO(synk): deep levels (<128 voxels per channel) fall back to XLA conv.
    return _conv_bn_relu_xla(_conv_bn_relu_xla(x, p1), p2)


def _final(x, cb, w3, b3):
    D, H, W = x.shape[2:]
    if _pallas_ok(D, H, W):
        return _final_block(x, cb, w3, b3)
    y = _conv_bn_relu_xla(x, cb).astype(jnp.float32)
    s_ = w3.shape[0]
    return jnp.sum(y * w3.reshape(1, s_, 1, 1, 1), axis=1, keepdims=True) + b3[0, 0]


# -----------------------------------------------------------------------------
# Parameter construction (deterministic, synthetic).  Canonical weights are
# (Cout, 27, Cin) f32 with taps ordered (kd, kh, kw); BN is folded into a
# per-channel scale/shift (inference mode).
# -----------------------------------------------------------------------------
def _init_conv_bn(key, cin, cout, eps=1e-5):
    ks = jax.random.split(key, 5)
    w = jax.random.normal(ks[0], (cout, 27, cin), jnp.float32) / np.sqrt(27 * cin)
    gamma = 1.0 + 0.1 * jax.random.normal(ks[1], (cout,), jnp.float32)
    beta = 0.1 * jax.random.normal(ks[2], (cout,), jnp.float32)
    mean = 0.1 * jax.random.normal(ks[3], (cout,), jnp.float32)
    var = jnp.abs(1.0 + 0.1 * jax.random.normal(ks[4], (cout,), jnp.float32))
    scale = gamma / jnp.sqrt(var + eps)
    shift = beta - mean * scale
    return dict(w=w, scale=scale.reshape(cout, 1), shift=shift.reshape(cout, 1))


def init_unet_params(key, s=8):
    _probe_roll_sign()
    specs = {
        "start": (1, s, s),
        "down1": (s, 2 * s, 2 * s),
        "down2": (2 * s, 4 * s, 4 * s),
        "bridge": (4 * s, 8 * s, 4 * s),
        "up2": (8 * s, 4 * s, 2 * s),
        "up1": (4 * s, 2 * s, s),
    }
    params = {}
    for name, (cin, cmid, cout) in specs.items():
        key, k1, k2 = jax.random.split(key, 3)
        params[name] = (_init_conv_bn(k1, cin, cmid), _init_conv_bn(k2, cmid, cout))
    key, k1, k2, k3 = jax.random.split(key, 4)
    params["final"] = dict(
        cb=_init_conv_bn(k1, 2 * s, s),
        w3=jax.random.normal(k2, (s, 1), jnp.float32) / np.sqrt(s),   # Conv3d(s,1,1)
        b3=0.1 * jax.random.normal(k3, (1, 1), jnp.float32),
    )
    return params


# -----------------------------------------------------------------------------
# Forward pass (pool / upsample / concat glue in plain JAX on bf16 NCDHW).
# -----------------------------------------------------------------------------
def _maxpool2(x):                       # (N, C, D, H, W), even spatial dims
    n, c, d, h, w = x.shape
    x = x.reshape(n, c, d // 2, 2, h // 2, 2, w // 2, 2)
    return x.max(axis=(3, 5, 7))


def _upsample_nearest_2x(x):            # exact 2x nearest (F.interpolate default)
    n, c, d, h, w = x.shape
    x = jnp.broadcast_to(x[:, :, :, None, :, None, :, None],
                         (n, c, d, 2, h, 2, w, 2))
    return x.reshape(n, c, 2 * d, 2 * h, 2 * w)


def unet_forward(params, x_ncdhw):
    x = x_ncdhw.astype(jnp.bfloat16)    # (N, 1, D, H, W) - bf16 activations

    def block(name, t):
        p1, p2 = params[name]
        return _unet_block(t, p1, p2)

    r0 = block("start", x)
    r1 = block("down1", _maxpool2(r0))
    r2 = block("down2", _maxpool2(r1))
    u = _upsample_nearest_2x(block("bridge", _maxpool2(r2)))
    u = _upsample_nearest_2x(block("up2", jnp.concatenate([u, r2], axis=1)))
    u = _upsample_nearest_2x(block("up1", jnp.concatenate([u, r1], axis=1)))
    xcat = jnp.concatenate([u, r0], axis=1)
    f = params["final"]
    return _final(xcat, f["cb"], f["w3"], f["b3"])     # (N, 1, D, H, W) f32


if __name__ == "__main__":
    key = jax.random.PRNGKey(0)
    kp, kx = jax.random.split(key)
    s = 8
    params = init_unet_params(kp, s=s)
    x = jax.random.normal(kx, (2, 1, 16, 16, 16), jnp.float32)  # NCDHW, like torch
    fwd = jax.jit(unet_forward)
    out = fwd(params, x)
    jax.block_until_ready(out)
    assert out.shape == (2, 1, 16, 16, 16), out.shape
    assert bool(jnp.all(jnp.isfinite(out)))
    print("KERNEL_OK")
</pallas_src>

<mosaic_0001>
module attributes {stable_mosaic.version = 11 : i64} {
  func.func @kern(%arg0: memref<8x128xf32, #tpu.memory_space<vmem>>, %arg1: memref<8x128xf32, #tpu.memory_space<vmem>>) attributes {dimension_semantics = [], scalar_prefetch = 0 : i64, scratch_operands = 0 : i64, tpu.core_type = #tpu.core_type<tc>} {
    %c0 = arith.constant 0 : index
    %c0_0 = arith.constant 0 : index
    %0 = vector.load %arg0[%c0, %c0_0] : memref<8x128xf32, #tpu.memory_space<vmem>>, vector<8x128xf32>
    %c1_i32 = arith.constant 1 : i32
    %1 = tpu.dynamic_rotate %0 by %c1_i32 dim 1 : vector<8x128xf32>, i32 -> vector<8x128xf32>
    %c0_1 = arith.constant 0 : index
    %c0_2 = arith.constant 0 : index
    %2 = vector.load %arg1[%c0_1, %c0_2] : memref<8x128xf32, #tpu.memory_space<vmem>>, vector<8x128xf32>
    tpu.vector_store %arg1[%c0_1, %c0_2], %1 {strides = array<i32>} : memref<8x128xf32, #tpu.memory_space<vmem>>, vector<8x128xf32>,
    return
  }
}

</mosaic_0001>

<bundles_post_ra>
// kernel: tpu_custom_call.1
= control target key start
LH: loop header
LB: loop body
LE: loop exit
PB: predicated region body
PF: predicated region fallthrough
CT: control target
= control target key end

     0   :  { %6 = vsyncpa [#allocation3], 0  ;;  %s106_s0 = inlined_call_operand.hbm [shape: f32[8,128], index: 0, kind: input, shape index: {}]   ;;  %s107_s1 = inlined_call_operand.hbm [shape: f32[8,128], index: 1, kind: output, shape index: {}]  }
   0x1   :  { %7 = vsyncpa [#allocation4], 0  ;;  %s87_s6 = smov [#allocation2]  }
   0x2   :  { %s14_s7 = sshll.u32 %s87_s6, 4  ;;  %s15_s7 = int_to_ptr.vmem [resolvable:$true] %s14_s7 }
   0x3   :  { %s51_s8 = scalar_lea.vmem %s15_s7, 128  ;;  %p56_p1 = scmp.lt.s32.totalorder %s15_s7, %s15_s7 }
   0x4   :  { %p52_p0 = scmp.ne.s32.totalorder %s15_s7, %s51_s8  ;;  %p57_p2 = scmp.lt.s32.totalorder %s51_s8, %s51_s8 }
   0x6   :  { %p58_p3 = por %p57_p2, %p56_p1 }
   0x8   :  { %p59_p4 = pnand %p58_p3, %p52_p0 }
   0xa   :  { %62 = shalt.err (!%p59_p4)
}
   0xb   :  { %17 = dma.hbm_to_vmem [thread:$0]  %s106_s0, 128, %s15_s7, [#allocation3]  }
   0xc   :  { %83 = dma.done.wait [#allocation3], 128  }
   0xd   :  { %84 = vsyncadd [#allocation3], 4294967168  ;;  %v21_v0 = vld [vmem:[#allocation2] sm:$0xff]  ;;  %s88_s11 = smov 1   ;;  %s89_s12 = smov [#allocation5]  }
   0xe   :  { %22 = vrot.lane.b32.xlu0 %v21_v0, %s88_s11  ;;  %s31_s13 = sshll.u32 %s89_s12, 4  ;;  %s32_s13 = int_to_ptr.vmem [resolvable:$true] %s31_s13 }
   0xf   :  { %s63_s14 = scalar_lea.vmem %s32_s13, 128  ;;  %p68_p6 = scmp.lt.s32.totalorder %s32_s13, %s32_s13 }
  0x10   :  { %p64_p5 = scmp.ne.s32.totalorder %s32_s13, %s63_s14  ;;  %p69_p7 = scmp.lt.s32.totalorder %s63_s14, %s63_s14 }
  0x12   :  { %p70_p8 = por %p69_p7, %p68_p6 }
  0x14   :  { %p71_p9 = pnand %p70_p8, %p64_p5 }
  0x80   :  { %v23_v1 = vpop.permute.xlu0 %22 }
  0x81   :  { %24 = vst [vmem:[#allocation5] sm:$0xff] %v23_v1 }
  0x82   :  { %74 = shalt.err (!%p71_p9)
}
  0x83   :  { %34 = dma.vmem_to_hbm [thread:$0]  %s32_s13, 128, %s107_s1, [#allocation4]  }
  0x84   :  { %85 = dma.done.wait [#allocation4], 128  }
  0x85   :  { %86 = vsyncadd [#allocation4], 4294967168 }
  0x86   :  { %38 = vsyncpa [#allocation3], 1 }
  0x87   :  { %39 = vsyncpa [#allocation4], 1 }

</bundles_post_ra>
